<compile_context>
chip_gen: v7x
topology: tpu7x:2x2x1
jax: 0.10.0
libtpu: 0.0.40
codegen_flags: <defaults>
</compile_context>

<pallas_src>
import functools

import jax
import jax.numpy as jnp
from jax.experimental import pallas as pl
from jax.experimental.pallas import tpu as pltpu

_LANE = 128
_SUBLANE = 8


def _dilated_copy_kernel(x_ref, o_ref, *, k_out, dilation):
    """x_ref: (TR, K_in) block, o_ref: (TR, k_out) block; o[:, j] = x[:, j*dilation]."""
    if dilation == 1:
        # Degenerate case (module default): dense lane/sublane tile copy.
        o_ref[...] = x_ref[...]
    else:
        # Fully unrolled static column copies.  Only contiguous static windows
        # are used -> guaranteed Mosaic lowering; k_out masked vld/vst per
        # 8 rows, overlapped with the block DMAs by the pipeline.
        for j in range(k_out):
            c = j * dilation
            o_ref[:, j:j + 1] = x_ref[:, c:c + 1]


def _pick_tile_rows(n_rows, k_in, k_out, itemsize, *,
                    vmem_budget_bytes=6 << 20, tr_max=8192):
    """Pick the row tile TR (sublane axis of both blocks).

    VMEM per grid step ~= 2 pipeline buffers each for the input and output
    block; the narrow neighbor axis is lane-padded to a multiple of 128.
    A 6 MiB budget keeps us comfortably inside every generation's scoped-VMEM
    default (v5e 16 MiB, v6e 32 MiB, v7x 32 MiB default / 64 MiB physical),
    while keeping each grid step large enough (>100 KiB real data) that the
    ~0.35 us per-step overhead is negligible.
    """
    lanes_in = pl.cdiv(k_in, _LANE) * _LANE
    lanes_out = pl.cdiv(k_out, _LANE) * _LANE
    bytes_per_row = 2 * (lanes_in + lanes_out) * itemsize   # 2 buffers x (in + out)
    sub_mult = max(_SUBLANE, 32 // max(1, itemsize))        # packed dtypes: taller tiles
    tr_fit = max(sub_mult, vmem_budget_bytes // bytes_per_row)
    tr = max(sub_mult, min(tr_max, (tr_fit // sub_mult) * sub_mult))
    # Full-dim block is always legal; otherwise TR is a multiple of sub_mult.
    return n_rows if tr >= n_rows else tr


def dense_dilated_rows(x2d, dilation, *, tr=None):
    """Dilated neighbor selection on the row-major 2-D view (no layout glue).

    x2d: (R, K_in) integer array (R = 2*B*N).
    out: (R, k_out) with out[r, j] == x2d[r, j*dilation], k_out = ceil(K_in/dilation).
    """
    R, K_in = x2d.shape
    assert dilation >= 1
    k_out = pl.cdiv(K_in, dilation)           # == len(range(0, K_in, dilation))
    itemsize = jnp.dtype(x2d.dtype).itemsize
    if tr is None:
        tr = _pick_tile_rows(R, K_in, k_out, itemsize)
    assert tr == R or tr % _SUBLANE == 0

    kernel = functools.partial(_dilated_copy_kernel, k_out=k_out, dilation=dilation)
    grid = (pl.cdiv(R, tr),)
    return pl.pallas_call(
        kernel,
        out_shape=jax.ShapeDtypeStruct((R, k_out), x2d.dtype),
        grid=grid,
        in_specs=[pl.BlockSpec((tr, K_in), lambda i: (i, 0))],
        out_specs=pl.BlockSpec((tr, k_out), lambda i: (i, 0)),
        compiler_params=pltpu.CompilerParams(
            dimension_semantics=("parallel",)),   # v7x: shard row tiles over 2 TCs
        cost_estimate=pl.CostEstimate(
            flops=0, transcendentals=0,
            bytes_accessed=R * (K_in + k_out) * itemsize),
    )(x2d)


def dense_dilated(edge_index, k=None, dilation=1, stochastic=False,
                  epsilon=0.0, training=False, tr=None):
    """Pallas implementation of DenseDilated.forward (deterministic branch).

    edge_index: int array of shape (2, B, N, K_in)
    returns:    int array of shape (2, B, N, ceil(K_in/dilation)),
                == edge_index[:, :, :, ::dilation]
    """
    # TODO(synk): stochastic randperm branch (torch.rand(1) < epsilon and
    # self.training) is not implemented; deterministic eval-mode semantics only.
    two, B, N, K_in = edge_index.shape
    assert two == 2
    k_out = pl.cdiv(K_in, dilation)
    if k is not None and K_in % dilation == 0:
        assert k == k_out, (k, k_out)
    R = two * B * N

    # Free reshapes only -- no transposes, no extra HBM passes.
    x2d = edge_index.reshape(R, K_in)
    out2d = dense_dilated_rows(x2d, dilation, tr=tr)
    return out2d.reshape(two, B, N, k_out)


if __name__ == "__main__":
    key = jax.random.PRNGKey(0)

    # Case 1: module-typical shapes -- k=4 kept neighbors, dilation=2,
    # so the incoming neighbor list has k*dilation = 8 candidates.
    k1, d1, B1, N1 = 4, 2, 2, 16
    key, sub = jax.random.split(key)
    e1 = jax.random.randint(sub, (2, B1, N1, k1 * d1), 0, N1, dtype=jnp.int32)
    o1 = jax.block_until_ready(dense_dilated(e1, k=k1, dilation=d1))
    r1 = e1[:, :, :, ::d1]
    assert o1.shape == (2, B1, N1, k1) and o1.dtype == e1.dtype
    assert bool(jnp.all(o1 == r1)), "case1 mismatch vs reference strided slice"

    # Case 2: multiple row tiles with a ragged tail (R = 2*2*50 = 200, forced
    # tr=64 -> grid of 4) and K_in NOT divisible by dilation (10 with d=3 ->
    # 4 output columns: 0,3,6,9), matching PyTorch ::3 semantics.
    d2, B2, N2, Kin2 = 3, 2, 50, 10
    key, sub = jax.random.split(key)
    e2 = jax.random.randint(sub, (2, B2, N2, Kin2), 0, N2, dtype=jnp.int32)
    o2 = jax.block_until_ready(dense_dilated(e2, dilation=d2, tr=64))
    r2 = e2[:, :, :, ::d2]
    assert o2.shape == r2.shape and bool(jnp.all(o2 == r2)), "case2 mismatch"

    # Case 3: dilation=1 degenerate path (pure tiled copy).
    k3, d3, B3, N3 = 5, 1, 2, 16
    key, sub = jax.random.split(key)
    e3 = jax.random.randint(sub, (2, B3, N3, k3 * d3), 0, N3, dtype=jnp.int32)
    o3 = jax.block_until_ready(dense_dilated(e3, k=k3, dilation=d3))
    assert bool(jnp.all(o3 == e3[:, :, :, ::d3])), "case3 mismatch"

    # Case 4: default (auto) tiling with more than one grid step
    # (R = 2*2*1024 = 4096 rows > default row tile).
    k4, d4, B4, N4 = 9, 2, 2, 1024
    key, sub = jax.random.split(key)
    e4 = jax.random.randint(sub, (2, B4, N4, k4 * d4), 0, N4, dtype=jnp.int32)
    o4 = jax.block_until_ready(dense_dilated(e4, k=k4, dilation=d4))
    assert o4.shape == (2, B4, N4, k4) and bool(jnp.all(o4 == e4[:, :, :, ::d4])), \
        "case4 mismatch"

    print("KERNEL_OK")
</pallas_src>

<mosaic_0001>
module attributes {stable_mosaic.version = 11 : i64} {
  func.func @_dilated_copy_kernel(%arg0: i32, %arg1: memref<64x8xi32, #tpu.memory_space<vmem>>, %arg2: memref<64x4xi32, #tpu.memory_space<vmem>>) attributes {dimension_semantics = [#tpu.dimension_semantics<parallel>], iteration_bounds = array<i64: 1>, scalar_prefetch = 0 : i64, scratch_operands = 0 : i64, tpu.core_type = #tpu.core_type<tc>, window_params = [{transform_indices = @transform_0, window_bounds = array<i64: 64, 8>}, {transform_indices = @transform_1, window_bounds = array<i64: 64, 4>}]} {
    %c0 = arith.constant 0 : index
    %c0_0 = arith.constant 0 : index
    %0 = vector.load %arg1[%c0, %c0_0] : memref<64x8xi32, #tpu.memory_space<vmem>>, vector<64x1xi32>
    %c0_1 = arith.constant 0 : index
    %c0_2 = arith.constant 0 : index
    %1 = vector.load %arg2[%c0_1, %c0_2] : memref<64x4xi32, #tpu.memory_space<vmem>>, vector<64x1xi32>
    tpu.vector_store %arg2[%c0_1, %c0_2], %0 {strides = array<i32>} : memref<64x4xi32, #tpu.memory_space<vmem>>, vector<64x1xi32>,
    %c0_3 = arith.constant 0 : index
    %c2 = arith.constant 2 : index
    %2 = vector.load %arg1[%c0_3, %c2] : memref<64x8xi32, #tpu.memory_space<vmem>>, vector<64x1xi32>
    %c0_4 = arith.constant 0 : index
    %c1 = arith.constant 1 : index
    %3 = vector.load %arg2[%c0_4, %c1] : memref<64x4xi32, #tpu.memory_space<vmem>>, vector<64x1xi32>
    tpu.vector_store %arg2[%c0_4, %c1], %2 {strides = array<i32>} : memref<64x4xi32, #tpu.memory_space<vmem>>, vector<64x1xi32>,
    %c0_5 = arith.constant 0 : index
    %c4 = arith.constant 4 : index
    %4 = vector.load %arg1[%c0_5, %c4] : memref<64x8xi32, #tpu.memory_space<vmem>>, vector<64x1xi32>
    %c0_6 = arith.constant 0 : index
    %c2_7 = arith.constant 2 : index
    %5 = vector.load %arg2[%c0_6, %c2_7] : memref<64x4xi32, #tpu.memory_space<vmem>>, vector<64x1xi32>
    tpu.vector_store %arg2[%c0_6, %c2_7], %4 {strides = array<i32>} : memref<64x4xi32, #tpu.memory_space<vmem>>, vector<64x1xi32>,
    %c0_8 = arith.constant 0 : index
    %c6 = arith.constant 6 : index
    %6 = vector.load %arg1[%c0_8, %c6] : memref<64x8xi32, #tpu.memory_space<vmem>>, vector<64x1xi32>
    %c0_9 = arith.constant 0 : index
    %c3 = arith.constant 3 : index
    %7 = vector.load %arg2[%c0_9, %c3] : memref<64x4xi32, #tpu.memory_space<vmem>>, vector<64x1xi32>
    tpu.vector_store %arg2[%c0_9, %c3], %6 {strides = array<i32>} : memref<64x4xi32, #tpu.memory_space<vmem>>, vector<64x1xi32>,
    return
  }
  func.func @transform_0(%arg0: i32) -> (i32, i32) {
    %c0_i32 = arith.constant 0 : i32
    %c0_i32_0 = arith.constant 0 : i32
    return %arg0, %c0_i32 : i32, i32
  }
  func.func @transform_1(%arg0: i32) -> (i32, i32) {
    %c0_i32 = arith.constant 0 : i32
    %c0_i32_0 = arith.constant 0 : i32
    return %arg0, %c0_i32 : i32, i32
  }
}

</mosaic_0001>

<bundles_post_ra>
// kernel: tpu_custom_call.1
= control target key start
LH: loop header
LB: loop body
LE: loop exit
PB: predicated region body
PF: predicated region fallthrough
CT: control target
= control target key end

     0   :  { %vm16_vm0 = vcmask 7168   ;;  %s131_s12 = smov 127   ;;  %s132_s9 = smov 126   ;;  %vm49_vm1 = vcmask 15368   ;;  %vm82_vm2 = vcmask 23568   ;;  %vm115_vm3 = vcmask 31768   ;;  %s296_s0 = inlined_call_operand.vmem [shape: s32[64,8], index: 0, kind: input, shape index: {}]   ;;  %s297_s1 = inlined_call_operand.vmem [shape: s32[64,4], index: 1, kind: output, shape index: {}]  }
   0x1   :  { %v27_v0 = vld [vmem:[%s296_s0 + $0x10] sm:$0xff]  ;;  %v25_v1 = vld [vmem:[%s296_s0] sm:$0xff]  ;;  %v28_v2 = vld [vmem:[%s296_s0 + $0x18] sm:$0xff]  ;;  %s133_s10 = smov 125  }
   0x2   :  { %37 = vrot.lane.b32.xlu1 %v27_v0, %s131_s12  ;;  %33 = vrot.lane.b32.xlu0 %v25_v1, %s131_s12  ;;  %v26_v3 = vld [vmem:[%s296_s0 + $0x8] sm:$0xff]  ;;  %19 = vst.msk [vmem:[%s297_s1 + $0x10] sm:$0xff] %vm16_vm0, %v27_v0 }
   0x3   :  { %v30_v4 = vld [vmem:[%s296_s0 + $0x28] sm:$0xff]  ;;  %17 = vst.msk [vmem:[%s297_s1] sm:$0xff] %vm16_vm0, %v25_v1  ;;  %20 = vst.msk [vmem:[%s297_s1 + $0x18] sm:$0xff] %vm16_vm0, %v28_v2  ;;  %v29_v5 = vld [vmem:[%s296_s0 + $0x20] sm:$0xff] }
   0x4   :  { %v32_v6 = vld [vmem:[%s296_s0 + $0x38] sm:$0xff]  ;;  %v31_v7 = vld [vmem:[%s296_s0 + $0x30] sm:$0xff]  ;;  %18 = vst.msk [vmem:[%s297_s1 + $0x8] sm:$0xff] %vm16_vm0, %v26_v3  ;;  %22 = vst.msk [vmem:[%s297_s1 + $0x28] sm:$0xff] %vm16_vm0, %v30_v4 }
   0x5   :  { %21 = vst.msk [vmem:[%s297_s1 + $0x20] sm:$0xff] %vm16_vm0, %v29_v5  ;;  %24 = vst.msk [vmem:[%s297_s1 + $0x38] sm:$0xff] %vm16_vm0, %v32_v6 }
   0x6   :  { %23 = vst.msk [vmem:[%s297_s1 + $0x30] sm:$0xff] %vm16_vm0, %v31_v7  ;;  %39 = vrot.lane.b32.xlu1 %v28_v2, %s131_s12  ;;  %35 = vrot.lane.b32.xlu0 %v26_v3, %s131_s12 }
   0xa   :  { %43 = vrot.lane.b32.xlu1 %v30_v4, %s131_s12  ;;  %41 = vrot.lane.b32.xlu0 %v29_v5, %s131_s12 }
   0xe   :  { %47 = vrot.lane.b32.xlu1 %v32_v6, %s131_s12  ;;  %45 = vrot.lane.b32.xlu0 %v31_v7, %s131_s12 }
  0x12   :  { %68 = vrot.lane.b32.xlu1 %v26_v3, %s132_s9  ;;  %66 = vrot.lane.b32.xlu0 %v25_v1, %s132_s9 }
  0x16   :  { %72 = vrot.lane.b32.xlu1 %v28_v2, %s132_s9  ;;  %70 = vrot.lane.b32.xlu0 %v27_v0, %s132_s9 }
  0x1a   :  { %76 = vrot.lane.b32.xlu1 %v30_v4, %s132_s9  ;;  %74 = vrot.lane.b32.xlu0 %v29_v5, %s132_s9 }
  0x1e   :  { %80 = vrot.lane.b32.xlu1 %v32_v6, %s132_s9  ;;  %78 = vrot.lane.b32.xlu0 %v31_v7, %s132_s9 }
  0x22   :  { %101 = vrot.lane.b32.xlu1 %v26_v3, %s133_s10  ;;  %99 = vrot.lane.b32.xlu0 %v25_v1, %s133_s10 }
  0x26   :  { %105 = vrot.lane.b32.xlu1 %v28_v2, %s133_s10  ;;  %103 = vrot.lane.b32.xlu0 %v27_v0, %s133_s10 }
  0x2a   :  { %109 = vrot.lane.b32.xlu1 %v30_v4, %s133_s10  ;;  %107 = vrot.lane.b32.xlu0 %v29_v5, %s133_s10 }
  0x2e   :  { %113 = vrot.lane.b32.xlu1 %v32_v6, %s133_s10  ;;  %111 = vrot.lane.b32.xlu0 %v31_v7, %s133_s10 }
  0x74   :  { %v38_v8 = vpop.permute.xlu1 %37  ;;  %v34_v9 = vpop.permute.xlu0 %33 }
  0x75   :  { %52 = vst.msk [vmem:[%s297_s1 + $0x10] sm:$0xff] %vm49_vm1, %v38_v8  ;;  %50 = vst.msk [vmem:[%s297_s1] sm:$0xff] %vm49_vm1, %v34_v9 }
  0x78   :  { %v40_v10 = vpop.permute.xlu1 %39  ;;  %v36_v11 = vpop.permute.xlu0 %35 }
  0x79   :  { %53 = vst.msk [vmem:[%s297_s1 + $0x18] sm:$0xff] %vm49_vm1, %v40_v10  ;;  %51 = vst.msk [vmem:[%s297_s1 + $0x8] sm:$0xff] %vm49_vm1, %v36_v11 }
  0x7c   :  { %v44_v12 = vpop.permute.xlu1 %43  ;;  %v42_v13 = vpop.permute.xlu0 %41 }
  0x7d   :  { %55 = vst.msk [vmem:[%s297_s1 + $0x28] sm:$0xff] %vm49_vm1, %v44_v12  ;;  %54 = vst.msk [vmem:[%s297_s1 + $0x20] sm:$0xff] %vm49_vm1, %v42_v13 }
  0x80   :  { %v48_v14 = vpop.permute.xlu1 %47  ;;  %v46_v15 = vpop.permute.xlu0 %45 }
  0x81   :  { %57 = vst.msk [vmem:[%s297_s1 + $0x38] sm:$0xff] %vm49_vm1, %v48_v14  ;;  %56 = vst.msk [vmem:[%s297_s1 + $0x30] sm:$0xff] %vm49_vm1, %v46_v15 }
  0x84   :  { %v69_v16 = vpop.permute.xlu1 %68  ;;  %v67_v17 = vpop.permute.xlu0 %66 }
  0x85   :  { %84 = vst.msk [vmem:[%s297_s1 + $0x8] sm:$0xff] %vm82_vm2, %v69_v16  ;;  %83 = vst.msk [vmem:[%s297_s1] sm:$0xff] %vm82_vm2, %v67_v17 }
  0x88   :  { %v73_v18 = vpop.permute.xlu1 %72  ;;  %v71_v19 = vpop.permute.xlu0 %70 }
  0x89   :  { %86 = vst.msk [vmem:[%s297_s1 + $0x18] sm:$0xff] %vm82_vm2, %v73_v18  ;;  %85 = vst.msk [vmem:[%s297_s1 + $0x10] sm:$0xff] %vm82_vm2, %v71_v19 }
  0x8c   :  { %v77_v20 = vpop.permute.xlu1 %76  ;;  %v75_v21 = vpop.permute.xlu0 %74 }
  0x8d   :  { %88 = vst.msk [vmem:[%s297_s1 + $0x28] sm:$0xff] %vm82_vm2, %v77_v20  ;;  %87 = vst.msk [vmem:[%s297_s1 + $0x20] sm:$0xff] %vm82_vm2, %v75_v21 }
  0x90   :  { %v81_v22 = vpop.permute.xlu1 %80  ;;  %v79_v23 = vpop.permute.xlu0 %78 }
  0x91   :  { %90 = vst.msk [vmem:[%s297_s1 + $0x38] sm:$0xff] %vm82_vm2, %v81_v22  ;;  %89 = vst.msk [vmem:[%s297_s1 + $0x30] sm:$0xff] %vm82_vm2, %v79_v23 }
  0x94   :  { %v102_v24 = vpop.permute.xlu1 %101  ;;  %v100_v25 = vpop.permute.xlu0 %99 }
  0x95   :  { %117 = vst.msk [vmem:[%s297_s1 + $0x8] sm:$0xff] %vm115_vm3, %v102_v24  ;;  %116 = vst.msk [vmem:[%s297_s1] sm:$0xff] %vm115_vm3, %v100_v25 }
  0x98   :  { %v106_v26 = vpop.permute.xlu1 %105  ;;  %v104_v27 = vpop.permute.xlu0 %103 }
  0x99   :  { %119 = vst.msk [vmem:[%s297_s1 + $0x18] sm:$0xff] %vm115_vm3, %v106_v26  ;;  %118 = vst.msk [vmem:[%s297_s1 + $0x10] sm:$0xff] %vm115_vm3, %v104_v27 }
  0x9c   :  { %v110_v28 = vpop.permute.xlu1 %109  ;;  %v108_v29 = vpop.permute.xlu0 %107 }
  0x9d   :  { %121 = vst.msk [vmem:[%s297_s1 + $0x28] sm:$0xff] %vm115_vm3, %v110_v28  ;;  %120 = vst.msk [vmem:[%s297_s1 + $0x20] sm:$0xff] %vm115_vm3, %v108_v29 }
  0xa0   :  { %v114_v30 = vpop.permute.xlu1 %113  ;;  %v112_v31 = vpop.permute.xlu0 %111 }
  0xa1   :  { %123 = vst.msk [vmem:[%s297_s1 + $0x38] sm:$0xff] %vm115_vm3, %v114_v30  ;;  %122 = vst.msk [vmem:[%s297_s1 + $0x30] sm:$0xff] %vm115_vm3, %v112_v31 }

</bundles_post_ra>
